<compile_context>
chip_gen: v7x
topology: tpu7x:2x2x1
jax: 0.10.0
libtpu: 0.0.40
codegen_flags: <defaults>
</compile_context>

<pallas_src>
from functools import partial

import jax
import jax.numpy as jnp
from jax.experimental import pallas as pl
from jax.experimental.pallas import tpu as pltpu

_LANES = 128
_SUBLANES = 8


def _tree_pool_kernel(w_ref, x_ref, o_ref, *, num_taps):
    # w_ref: SMEM (7, num_taps) f32, "folded" weight rows:
    #   [ (v1+v2)/4, (v1-v2)/4, (v3+v4)/4, (v3-v4)/4, w5/2, w6/2, w7/2 ]
    # x_ref: VMEM (num_taps, BR, 128) tap tile
    # o_ref: VMEM (BR, 128)
    # Hoist tap loads: each tap tile is read once and reused by all 7 weighted
    # accumulations (relieves the vld slot; VALU is the binding unit).
    taps = [x_ref[t].astype(jnp.float32) for t in range(num_taps)]

    def conv(k):  # static unroll over the P*P taps
        acc = w_ref[k, 0] * taps[0]
        for t in range(1, num_taps):
            acc = acc + w_ref[k, t] * taps[t]
        return acc

    a12 = conv(0)            # conv((v1+v2)/4)
    d12 = conv(1)            # conv((v1-v2)/4)
    a34 = conv(2)            # conv((v3+v4)/4)
    d34 = conv(3)            # conv((v3-v4)/4)
    t5 = jnp.tanh(conv(4))   # tanh(conv(w5)/2) == 2*sigmoid(conv(w5)) - 1
    t6 = jnp.tanh(conv(5))
    tr = jnp.tanh(conv(6))

    n5 = a12 + d12 * t5      # == node5 / 2
    n6 = a34 + d34 * t6      # == node6 / 2
    o_ref[...] = ((n5 + n6) + (n5 - n6) * tr).astype(o_ref.dtype)


def _pick_block_rows(n_rows, num_taps, budget_bytes=6 * 1024 * 1024):
    # Per grid step (double buffered): num_taps input tiles + 1 output tile.
    # 6 MiB fits v5e's 16 MiB scoped VMEM default and v7x's smaller VMEM; tiles
    # beyond ~1024 rows show no further roofline gain, so cap there.
    per_row = (num_taps + 1) * 2 * _LANES * 4
    cap = max(_SUBLANES, min(budget_bytes // per_row, 1024))
    cap -= cap % _SUBLANES
    r8 = ((n_rows + _SUBLANES - 1) // _SUBLANES) * _SUBLANES
    if r8 <= cap:
        return r8
    # Balance blocks so the padded tail is small (<= ~n_blocks * 8 rows).
    n_blocks = -(-r8 // cap)
    br = -(-r8 // n_blocks)
    br = ((br + _SUBLANES - 1) // _SUBLANES) * _SUBLANES
    return min(br, cap)


def _extract_taps(x, P, S, Hc, Wc):
    """Return the P*P strided conv taps as a (P*P, N) slab (tap index = p*P+q)."""
    B, C, H, W = x.shape
    if P == S and H % S == 0 and W % S == 0:
        # Non-overlapping windows: a single fused reshape+transpose pass.
        t = x.reshape(B, C, Hc, S, Wc, S)
        t = jnp.transpose(t, (3, 5, 0, 1, 2, 4))   # (p, q, B, C, Hc, Wc)
        return t.reshape(P * P, -1)
    # General (possibly overlapping) case: strided slices.
    taps = []
    for p in range(P):
        for q in range(P):
            sl = jax.lax.slice(
                x,
                (0, 0, p, q),
                (B, C, p + (Hc - 1) * S + 1, q + (Wc - 1) * S + 1),
                (1, 1, S, S),
            )
            taps.append(sl.reshape(-1))
    return jnp.stack(taps, axis=0)


def tree_level3(x, weights, kernel_size, stride):
    """x: (B, C, H, W). weights: (7, P*P) rows = [v1, v2, v3, v4, w5, w6, w7]."""
    B, C, H, W = x.shape
    P, S = int(kernel_size), int(stride)
    num_taps = P * P

    # Valid-conv output size, then reinterpret (torch .view) as (H//2, W//2),
    # exactly like the PyTorch module does.
    Hc = (H - P) // S + 1
    Wc = (W - P) // S + 1
    Ho, Wo = H // 2, W // 2
    if Hc * Wc != Ho * Wo:
        raise ValueError(
            "Tree_level3: conv output of shape (%d, %d) cannot be viewed as "
            "(H//2, W//2) = (%d, %d)" % (Hc, Wc, Ho, Wo)
        )

    # Fold sigmoid scaling and the lerp midpoints into the weight table.
    w = weights.astype(jnp.float32)
    w_fold = jnp.stack(
        [
            (w[0] + w[1]) * 0.25,
            (w[0] - w[1]) * 0.25,
            (w[2] + w[3]) * 0.25,
            (w[2] - w[3]) * 0.25,
            w[4] * 0.5,
            w[5] * 0.5,
            w[6] * 0.5,
        ],
        axis=0,
    )  # (7, num_taps)

    # TODO(synk): fold the PxP de-interleave into the kernel (strided lane /
    # sublane reads of x) to remove this slab's extra HBM round-trip; kept in
    # the wrapper for robust lowering across P/S/W shapes.
    x_taps = _extract_taps(x, P, S, Hc, Wc)  # (num_taps, N)

    N = B * C * Hc * Wc
    n_rows = pl.cdiv(N, _LANES)
    br = _pick_block_rows(n_rows, num_taps)
    rows_pad = ((n_rows + br - 1) // br) * br
    n_pad = rows_pad * _LANES
    x_taps = jnp.pad(x_taps, ((0, 0), (0, n_pad - N)))
    x_taps = x_taps.reshape(num_taps, rows_pad, _LANES)

    grid = (rows_pad // br,)
    out = pl.pallas_call(
        partial(_tree_pool_kernel, num_taps=num_taps),
        out_shape=jax.ShapeDtypeStruct((rows_pad, _LANES), x.dtype),
        grid=grid,
        in_specs=[
            pl.BlockSpec(memory_space=pltpu.MemorySpace.SMEM),          # folded weights
            pl.BlockSpec((num_taps, br, _LANES), lambda i: (0, i, 0)),  # tap tiles
        ],
        out_specs=pl.BlockSpec((br, _LANES), lambda i: (i, 0)),
        compiler_params=pltpu.CompilerParams(
            dimension_semantics=("parallel",),          # megacore split on v7x
            vmem_limit_bytes=32 * 1024 * 1024,
        ),
    )(w_fold, x_taps)

    # Crop lane padding and reinterpret like the torch .view().
    return out.reshape(-1)[:N].reshape(B, C, Ho, Wo)


def _reference(x, weights, P, S):
    # Pure-JAX reference mirroring the PyTorch forward (depthwise via B*C batching).
    B, C, H, W = x.shape
    xr = x.reshape(B * C, 1, H, W)
    outs = []
    for k in range(7):
        w = weights[k].reshape(1, 1, P, P)
        o = jax.lax.conv_general_dilated(
            xr, w, (S, S), "VALID", dimension_numbers=("NCHW", "OIHW", "NCHW")
        )
        outs.append(o.reshape(B, C, H // 2, W // 2))
    l1, l2, l3, l4, i5, i6, r = outs
    s5, s6, sr = jax.nn.sigmoid(i5), jax.nn.sigmoid(i6), jax.nn.sigmoid(r)
    n5 = l1 * s5 + l2 * (1 - s5)
    n6 = l3 * s6 + l4 * (1 - s6)
    return n5 * sr + n6 * (1 - sr)


if __name__ == "__main__":
    kernel_size, stride = 2, 2
    B, C, H, W = 2, 4, 16, 16

    key = jax.random.PRNGKey(0)
    kx, kv_shared, kv2, kw5, kw6, kw7 = jax.random.split(key, 6)

    x = jax.random.normal(kx, (B, C, H, W), dtype=jnp.float32)

    # Deterministic parameter init, uniform in [0.25, 0.75] like the module.
    # In the PyTorch __init__, v1/v3/v4 wrap the same storage, so after init
    # they hold identical values -- reproduce that here.
    P2 = kernel_size * kernel_size
    u = lambda k: jax.random.uniform(k, (P2,), jnp.float32, 0.25, 0.75)
    v_shared = u(kv_shared)  # v1 == v3 == v4
    weights = jnp.stack(
        [v_shared, u(kv2), v_shared, v_shared, u(kw5), u(kw6), u(kw7)], axis=0
    )  # (7, P*P)

    out = tree_level3(x, weights, kernel_size, stride)
    out = jax.block_until_ready(out)

    ref = _reference(x, weights, kernel_size, stride)
    assert out.shape == (B, C, H // 2, W // 2), out.shape
    assert jnp.allclose(out, ref, atol=1e-5, rtol=1e-5), "mismatch vs reference"

    print("KERNEL_OK")
</pallas_src>

<mosaic_0001>
module attributes {stable_mosaic.version = 11 : i64} {
  func.func @_tree_pool_kernel(%arg0: i32, %arg1: memref<7x4xf32, #tpu.memory_space<smem>>, %arg2: memref<4x8x128xf32, #tpu.memory_space<vmem>>, %arg3: memref<8x128xf32, #tpu.memory_space<vmem>>) attributes {dimension_semantics = [#tpu.dimension_semantics<parallel>], iteration_bounds = array<i64: 1>, scalar_prefetch = 0 : i64, scratch_operands = 0 : i64, tpu.core_type = #tpu.core_type<tc>, window_params = [{transform_indices = @transform_0, window_bounds = array<i64: 7, 4>}, {transform_indices = @transform_1, window_bounds = array<i64: 4, 8, 128>}, {transform_indices = @transform_2, window_bounds = array<i64: 8, 128>}]} {
    %c0 = arith.constant 0 : index
    %c0_0 = arith.constant 0 : index
    %c0_1 = arith.constant 0 : index
    %0 = vector.load %arg2[%c0, %c0_0, %c0_1] : memref<4x8x128xf32, #tpu.memory_space<vmem>>, vector<1x8x128xf32>
    %1 = vector.shape_cast %0 : vector<1x8x128xf32> to vector<8x128xf32>
    %c1 = arith.constant 1 : index
    %c0_2 = arith.constant 0 : index
    %c0_3 = arith.constant 0 : index
    %2 = vector.load %arg2[%c1, %c0_2, %c0_3] : memref<4x8x128xf32, #tpu.memory_space<vmem>>, vector<1x8x128xf32>
    %3 = vector.shape_cast %2 : vector<1x8x128xf32> to vector<8x128xf32>
    %c2 = arith.constant 2 : index
    %c0_4 = arith.constant 0 : index
    %c0_5 = arith.constant 0 : index
    %4 = vector.load %arg2[%c2, %c0_4, %c0_5] : memref<4x8x128xf32, #tpu.memory_space<vmem>>, vector<1x8x128xf32>
    %5 = vector.shape_cast %4 : vector<1x8x128xf32> to vector<8x128xf32>
    %c3 = arith.constant 3 : index
    %c0_6 = arith.constant 0 : index
    %c0_7 = arith.constant 0 : index
    %6 = vector.load %arg2[%c3, %c0_6, %c0_7] : memref<4x8x128xf32, #tpu.memory_space<vmem>>, vector<1x8x128xf32>
    %7 = vector.shape_cast %6 : vector<1x8x128xf32> to vector<8x128xf32>
    %c0_8 = arith.constant 0 : index
    %c0_9 = arith.constant 0 : index
    %8 = memref.load %arg1[%c0_8, %c0_9] : memref<7x4xf32, #tpu.memory_space<smem>>
    %9 = vector.broadcast %8 : f32 to vector<8x128xf32>
    %10 = arith.mulf %9, %1 : vector<8x128xf32>
    %c0_10 = arith.constant 0 : index
    %c1_11 = arith.constant 1 : index
    %11 = memref.load %arg1[%c0_10, %c1_11] : memref<7x4xf32, #tpu.memory_space<smem>>
    %12 = vector.broadcast %11 : f32 to vector<8x128xf32>
    %13 = arith.mulf %12, %3 : vector<8x128xf32>
    %14 = arith.addf %10, %13 : vector<8x128xf32>
    %c0_12 = arith.constant 0 : index
    %c2_13 = arith.constant 2 : index
    %15 = memref.load %arg1[%c0_12, %c2_13] : memref<7x4xf32, #tpu.memory_space<smem>>
    %16 = vector.broadcast %15 : f32 to vector<8x128xf32>
    %17 = arith.mulf %16, %5 : vector<8x128xf32>
    %18 = arith.addf %14, %17 : vector<8x128xf32>
    %c0_14 = arith.constant 0 : index
    %c3_15 = arith.constant 3 : index
    %19 = memref.load %arg1[%c0_14, %c3_15] : memref<7x4xf32, #tpu.memory_space<smem>>
    %20 = vector.broadcast %19 : f32 to vector<8x128xf32>
    %21 = arith.mulf %20, %7 : vector<8x128xf32>
    %22 = arith.addf %18, %21 : vector<8x128xf32>
    %c1_16 = arith.constant 1 : index
    %c0_17 = arith.constant 0 : index
    %23 = memref.load %arg1[%c1_16, %c0_17] : memref<7x4xf32, #tpu.memory_space<smem>>
    %24 = vector.broadcast %23 : f32 to vector<8x128xf32>
    %25 = arith.mulf %24, %1 : vector<8x128xf32>
    %c1_18 = arith.constant 1 : index
    %c1_19 = arith.constant 1 : index
    %26 = memref.load %arg1[%c1_18, %c1_19] : memref<7x4xf32, #tpu.memory_space<smem>>
    %27 = vector.broadcast %26 : f32 to vector<8x128xf32>
    %28 = arith.mulf %27, %3 : vector<8x128xf32>
    %29 = arith.addf %25, %28 : vector<8x128xf32>
    %c1_20 = arith.constant 1 : index
    %c2_21 = arith.constant 2 : index
    %30 = memref.load %arg1[%c1_20, %c2_21] : memref<7x4xf32, #tpu.memory_space<smem>>
    %31 = vector.broadcast %30 : f32 to vector<8x128xf32>
    %32 = arith.mulf %31, %5 : vector<8x128xf32>
    %33 = arith.addf %29, %32 : vector<8x128xf32>
    %c1_22 = arith.constant 1 : index
    %c3_23 = arith.constant 3 : index
    %34 = memref.load %arg1[%c1_22, %c3_23] : memref<7x4xf32, #tpu.memory_space<smem>>
    %35 = vector.broadcast %34 : f32 to vector<8x128xf32>
    %36 = arith.mulf %35, %7 : vector<8x128xf32>
    %37 = arith.addf %33, %36 : vector<8x128xf32>
    %c2_24 = arith.constant 2 : index
    %c0_25 = arith.constant 0 : index
    %38 = memref.load %arg1[%c2_24, %c0_25] : memref<7x4xf32, #tpu.memory_space<smem>>
    %39 = vector.broadcast %38 : f32 to vector<8x128xf32>
    %40 = arith.mulf %39, %1 : vector<8x128xf32>
    %c2_26 = arith.constant 2 : index
    %c1_27 = arith.constant 1 : index
    %41 = memref.load %arg1[%c2_26, %c1_27] : memref<7x4xf32, #tpu.memory_space<smem>>
    %42 = vector.broadcast %41 : f32 to vector<8x128xf32>
    %43 = arith.mulf %42, %3 : vector<8x128xf32>
    %44 = arith.addf %40, %43 : vector<8x128xf32>
    %c2_28 = arith.constant 2 : index
    %c2_29 = arith.constant 2 : index
    %45 = memref.load %arg1[%c2_28, %c2_29] : memref<7x4xf32, #tpu.memory_space<smem>>
    %46 = vector.broadcast %45 : f32 to vector<8x128xf32>
    %47 = arith.mulf %46, %5 : vector<8x128xf32>
    %48 = arith.addf %44, %47 : vector<8x128xf32>
    %c2_30 = arith.constant 2 : index
    %c3_31 = arith.constant 3 : index
    %49 = memref.load %arg1[%c2_30, %c3_31] : memref<7x4xf32, #tpu.memory_space<smem>>
    %50 = vector.broadcast %49 : f32 to vector<8x128xf32>
    %51 = arith.mulf %50, %7 : vector<8x128xf32>
    %52 = arith.addf %48, %51 : vector<8x128xf32>
    %c3_32 = arith.constant 3 : index
    %c0_33 = arith.constant 0 : index
    %53 = memref.load %arg1[%c3_32, %c0_33] : memref<7x4xf32, #tpu.memory_space<smem>>
    %54 = vector.broadcast %53 : f32 to vector<8x128xf32>
    %55 = arith.mulf %54, %1 : vector<8x128xf32>
    %c3_34 = arith.constant 3 : index
    %c1_35 = arith.constant 1 : index
    %56 = memref.load %arg1[%c3_34, %c1_35] : memref<7x4xf32, #tpu.memory_space<smem>>
    %57 = vector.broadcast %56 : f32 to vector<8x128xf32>
    %58 = arith.mulf %57, %3 : vector<8x128xf32>
    %59 = arith.addf %55, %58 : vector<8x128xf32>
    %c3_36 = arith.constant 3 : index
    %c2_37 = arith.constant 2 : index
    %60 = memref.load %arg1[%c3_36, %c2_37] : memref<7x4xf32, #tpu.memory_space<smem>>
    %61 = vector.broadcast %60 : f32 to vector<8x128xf32>
    %62 = arith.mulf %61, %5 : vector<8x128xf32>
    %63 = arith.addf %59, %62 : vector<8x128xf32>
    %c3_38 = arith.constant 3 : index
    %c3_39 = arith.constant 3 : index
    %64 = memref.load %arg1[%c3_38, %c3_39] : memref<7x4xf32, #tpu.memory_space<smem>>
    %65 = vector.broadcast %64 : f32 to vector<8x128xf32>
    %66 = arith.mulf %65, %7 : vector<8x128xf32>
    %67 = arith.addf %63, %66 : vector<8x128xf32>
    %c4 = arith.constant 4 : index
    %c0_40 = arith.constant 0 : index
    %68 = memref.load %arg1[%c4, %c0_40] : memref<7x4xf32, #tpu.memory_space<smem>>
    %69 = vector.broadcast %68 : f32 to vector<8x128xf32>
    %70 = arith.mulf %69, %1 : vector<8x128xf32>
    %c4_41 = arith.constant 4 : index
    %c1_42 = arith.constant 1 : index
    %71 = memref.load %arg1[%c4_41, %c1_42] : memref<7x4xf32, #tpu.memory_space<smem>>
    %72 = vector.broadcast %71 : f32 to vector<8x128xf32>
    %73 = arith.mulf %72, %3 : vector<8x128xf32>
    %74 = arith.addf %70, %73 : vector<8x128xf32>
    %c4_43 = arith.constant 4 : index
    %c2_44 = arith.constant 2 : index
    %75 = memref.load %arg1[%c4_43, %c2_44] : memref<7x4xf32, #tpu.memory_space<smem>>
    %76 = vector.broadcast %75 : f32 to vector<8x128xf32>
    %77 = arith.mulf %76, %5 : vector<8x128xf32>
    %78 = arith.addf %74, %77 : vector<8x128xf32>
    %c4_45 = arith.constant 4 : index
    %c3_46 = arith.constant 3 : index
    %79 = memref.load %arg1[%c4_45, %c3_46] : memref<7x4xf32, #tpu.memory_space<smem>>
    %80 = vector.broadcast %79 : f32 to vector<8x128xf32>
    %81 = arith.mulf %80, %7 : vector<8x128xf32>
    %82 = arith.addf %78, %81 : vector<8x128xf32>
    %83 = math.tanh %82 : vector<8x128xf32>
    %c5 = arith.constant 5 : index
    %c0_47 = arith.constant 0 : index
    %84 = memref.load %arg1[%c5, %c0_47] : memref<7x4xf32, #tpu.memory_space<smem>>
    %85 = vector.broadcast %84 : f32 to vector<8x128xf32>
    %86 = arith.mulf %85, %1 : vector<8x128xf32>
    %c5_48 = arith.constant 5 : index
    %c1_49 = arith.constant 1 : index
    %87 = memref.load %arg1[%c5_48, %c1_49] : memref<7x4xf32, #tpu.memory_space<smem>>
    %88 = vector.broadcast %87 : f32 to vector<8x128xf32>
    %89 = arith.mulf %88, %3 : vector<8x128xf32>
    %90 = arith.addf %86, %89 : vector<8x128xf32>
    %c5_50 = arith.constant 5 : index
    %c2_51 = arith.constant 2 : index
    %91 = memref.load %arg1[%c5_50, %c2_51] : memref<7x4xf32, #tpu.memory_space<smem>>
    %92 = vector.broadcast %91 : f32 to vector<8x128xf32>
    %93 = arith.mulf %92, %5 : vector<8x128xf32>
    %94 = arith.addf %90, %93 : vector<8x128xf32>
    %c5_52 = arith.constant 5 : index
    %c3_53 = arith.constant 3 : index
    %95 = memref.load %arg1[%c5_52, %c3_53] : memref<7x4xf32, #tpu.memory_space<smem>>
    %96 = vector.broadcast %95 : f32 to vector<8x128xf32>
    %97 = arith.mulf %96, %7 : vector<8x128xf32>
    %98 = arith.addf %94, %97 : vector<8x128xf32>
    %99 = math.tanh %98 : vector<8x128xf32>
    %c6 = arith.constant 6 : index
    %c0_54 = arith.constant 0 : index
    %100 = memref.load %arg1[%c6, %c0_54] : memref<7x4xf32, #tpu.memory_space<smem>>
    %101 = vector.broadcast %100 : f32 to vector<8x128xf32>
    %102 = arith.mulf %101, %1 : vector<8x128xf32>
    %c6_55 = arith.constant 6 : index
    %c1_56 = arith.constant 1 : index
    %103 = memref.load %arg1[%c6_55, %c1_56] : memref<7x4xf32, #tpu.memory_space<smem>>
    %104 = vector.broadcast %103 : f32 to vector<8x128xf32>
    %105 = arith.mulf %104, %3 : vector<8x128xf32>
    %106 = arith.addf %102, %105 : vector<8x128xf32>
    %c6_57 = arith.constant 6 : index
    %c2_58 = arith.constant 2 : index
    %107 = memref.load %arg1[%c6_57, %c2_58] : memref<7x4xf32, #tpu.memory_space<smem>>
    %108 = vector.broadcast %107 : f32 to vector<8x128xf32>
    %109 = arith.mulf %108, %5 : vector<8x128xf32>
    %110 = arith.addf %106, %109 : vector<8x128xf32>
    %c6_59 = arith.constant 6 : index
    %c3_60 = arith.constant 3 : index
    %111 = memref.load %arg1[%c6_59, %c3_60] : memref<7x4xf32, #tpu.memory_space<smem>>
    %112 = vector.broadcast %111 : f32 to vector<8x128xf32>
    %113 = arith.mulf %112, %7 : vector<8x128xf32>
    %114 = arith.addf %110, %113 : vector<8x128xf32>
    %115 = math.tanh %114 : vector<8x128xf32>
    %116 = arith.mulf %37, %83 : vector<8x128xf32>
    %117 = arith.addf %22, %116 : vector<8x128xf32>
    %118 = arith.mulf %67, %99 : vector<8x128xf32>
    %119 = arith.addf %52, %118 : vector<8x128xf32>
    %120 = arith.addf %117, %119 : vector<8x128xf32>
    %121 = arith.subf %117, %119 : vector<8x128xf32>
    %122 = arith.mulf %121, %115 : vector<8x128xf32>
    %123 = arith.addf %120, %122 : vector<8x128xf32>
    %c0_61 = arith.constant 0 : index
    %c0_62 = arith.constant 0 : index
    %124 = vector.load %arg3[%c0_61, %c0_62] : memref<8x128xf32, #tpu.memory_space<vmem>>, vector<8x128xf32>
    tpu.vector_store %arg3[%c0_61, %c0_62], %123 {strides = array<i32>} : memref<8x128xf32, #tpu.memory_space<vmem>>, vector<8x128xf32>,
    return
  }
  func.func @transform_0(%arg0: i32) -> (i32, i32) {
    %c0_i32 = arith.constant 0 : i32
    %c0_i32_0 = arith.constant 0 : i32
    %c0_i32_1 = arith.constant 0 : i32
    return %c0_i32, %c0_i32_0 : i32, i32
  }
  func.func @transform_1(%arg0: i32) -> (i32, i32, i32) {
    %c0_i32 = arith.constant 0 : i32
    %c0_i32_0 = arith.constant 0 : i32
    %c0_i32_1 = arith.constant 0 : i32
    return %c0_i32, %arg0, %c0_i32_0 : i32, i32, i32
  }
  func.func @transform_2(%arg0: i32) -> (i32, i32) {
    %c0_i32 = arith.constant 0 : i32
    %c0_i32_0 = arith.constant 0 : i32
    return %arg0, %c0_i32 : i32, i32
  }
}

</mosaic_0001>

<bundles_post_ra>
// kernel: tpu_custom_call.1
= control target key start
LH: loop header
LB: loop body
LE: loop exit
PB: predicated region body
PF: predicated region fallthrough
CT: control target
= control target key end

     0   :  { %7 = vsyncpa [#allocation5], 0  ;;  %s425_s0 = inlined_call_operand.vmem [shape: f32[7,4], index: 0, kind: input, shape index: {}]   ;;  %s426_s1 = inlined_call_operand.hbm [shape: f32[4,8,128], index: 1, kind: input, shape index: {}]   ;;  %s427_s2 = inlined_call_operand.hbm [shape: f32[8,128], index: 2, kind: output, shape index: {}]  }
   0x1   :  { %8 = vsyncpa [#allocation3], 0 }
   0x2   :  { %9 = vsyncpa [#allocation4], 0  ;;  %s16_s11 = sshll.u32 %s425_s0, 4  ;;  %s17_s11 = int_to_ptr.vmem [resolvable:$true] %s16_s11 }
   0x3   :  { %s217_s12 = scalar_lea.vmem %s17_s11, 128  ;;  %p222_p1 = scmp.lt.s32.totalorder %s17_s11, %s17_s11 }
   0x4   :  { %p218_p0 = scmp.ne.s32.totalorder %s17_s11, %s217_s12  ;;  %p223_p2 = scmp.lt.s32.totalorder %s217_s12, %s217_s12 }
   0x6   :  { %p224_p3 = por %p223_p2, %p222_p1 }
   0x8   :  { %p225_p4 = pnand %p224_p3, %p218_p0 }
   0xa   :  { %228 = shalt.err (!%p225_p4)
}
   0xb   :  { %s279_s13 = smov [#allocation2]   ;;  %s280_s14 = smov [#allocation6]  }
   0xc   :  { %19 = dma.vmem_to_smem %s17_s11, 128, %s279_s13, [#allocation5]  }
   0xd   :  { %s25_s15 = sshll.u32 %s280_s14, 4  ;;  %s229_s18 = scalar_lea.hbm %s426_s1, 512  ;;  %s26_s15 = int_to_ptr.vmem [resolvable:$true] %s25_s15 }
   0xe   :  { %p230_p5 = scmp.ne.s32.totalorder %s426_s1, %s229_s18  ;;  %p233_p6 = scmp.lt.u32.totalorder %s229_s18, %s426_s1 }
  0x10   :  { %p235_p7 = pnand %p233_p6, %p230_p5 }
  0x12   :  { %238 = shalt.err (!%p235_p7)
}
  0x13   :  { %s239_s22 = scalar_lea.vmem %s26_s15, 512  ;;  %p244_p9 = scmp.lt.s32.totalorder %s26_s15, %s26_s15 }
  0x14   :  { %p240_p8 = scmp.ne.s32.totalorder %s26_s15, %s239_s22  ;;  %p245_p10 = scmp.lt.s32.totalorder %s239_s22, %s239_s22 }
  0x16   :  { %p246_p11 = por %p245_p10, %p244_p9 }
  0x18   :  { %p247_p12 = pnand %p246_p11, %p240_p8 }
  0x1a   :  { %250 = shalt.err (!%p247_p12)
}
  0x1b   :  { %s281_s23 = smov 128   ;;  %s282_s24 = smov 8  }
  0x1c   :  { %31 = dma.hbm_to_vmem [thread:$0]  %s426_s1, 512, %s26_s15, [#allocation3], %s281_s23, %s281_s23, %s282_s24  }
  0x1d   :  { %273 = dma.done.wait [#allocation5], 128  }
  0x1e   :  { %274 = vsyncadd [#allocation5], 4294967168 }
  0x1f   :  { %275 = dma.done.wait [#allocation3], 512  }
  0x20   :  { %276 = vsyncadd [#allocation3], 4294966784 }
  0x21   :  { %38 = sfence }
  0x22   :  { %s46_s27 = sld [smem:[#allocation2]]  ;;  %s314_s28 = sld [smem:[#allocation2 + $0x1]]  ;;  %v39_v4 = vld [vmem:[#allocation6] sm:$0xff]  ;;  %v41_v6 = vld [vmem:[#allocation6 + $0x8] sm:$0xff]  ;;  %v361_v9 = vld [vmem:[#allocation6 + $0x10] sm:$0xff] }
  0x23   :  { %s316_s29 = sld [smem:[#allocation2 + $0x80]]  ;;  %s318_s30 = sld [smem:[#allocation2 + $0x81]]  ;;  %v372_v18 = vld [vmem:[#allocation6 + $0x18] sm:$0xff] }
  0x24   :  { %s320_s3 = sld [smem:[#allocation2 + $0x2]]  ;;  %s324_s1 = sld [smem:[#allocation2 + $0x83]] }
  0x25   :  { %s322_s4 = sld [smem:[#allocation2 + $0x82]]  ;;  %s326_s5 = sld [smem:[#allocation2 + $0x100]] }
  0x26   :  { %s328_s6 = sld [smem:[#allocation2 + $0x101]]  ;;  %s330_s7 = sld [smem:[#allocation2 + $0x180]] }
  0x27   :  { %s332_s8 = sld [smem:[#allocation2 + $0x181]]  ;;  %s334_s9 = sld [smem:[#allocation2 + $0x200]] }
  0x28   :  { %s336_s10 = sld [smem:[#allocation2 + $0x201]]  ;;  %s338_s11 = sld [smem:[#allocation2 + $0x202]]  ;;  %v47_v0 = vstv %s46_s27  ;;  %v50_v1 = vstv %s314_s28 }
  0x29   :  { %s340_s12 = sld [smem:[#allocation2 + $0x203]]  ;;  %s342_s13 = sld [smem:[#allocation2 + $0x280]]  ;;  %v62_v2 = vstv %s316_s29  ;;  %v65_v3 = vstv %s318_s30  ;;  %v48_v7 = vmul.f32 %v47_v0, %v39_v4  ;;  %v51_v10 = vmul.f32 %v50_v1, %v41_v6 }
  0x2a   :  { %s344_s14 = sld [smem:[#allocation2 + $0x281]]  ;;  %s349_s15 = sld [smem:[#allocation2 + $0x182]]  ;;  %v54_v8 = vstv %s320_s3  ;;  %v63_v11 = vmul.f32 %v62_v2, %v39_v4  ;;  %v66_v12 = vmul.f32 %v65_v3, %v41_v6  ;;  %v73_v15 = vstv %s324_s1 }
  0x2b   :  { %s351_s16 = sld [smem:[#allocation2 + $0x282]]  ;;  %v69_v5 = vstv %s322_s4  ;;  %s354_s17 = sld [smem:[#allocation2 + $0x283]]  ;;  %v77_v16 = vstv %s326_s5  ;;  %v52_v58 = vadd.f32 %v51_v10, %v48_v7  ;;  %v55_v59 = vmul.f32 %v54_v8, %v361_v9 }
  0x2c   :  { %s356_s18 = sld [smem:[#allocation2 + $0x300]]  ;;  %s359_s19 = sld [smem:[#allocation2 + $0x301]]  ;;  %v92_v13 = vstv %s330_s7  ;;  %v70_v14 = vmul.f32 %v69_v5, %v361_v9  ;;  %v80_v19 = vstv %s328_s6  ;;  %v67_v51 = vadd.f32 %v66_v12, %v63_v11 }
  0x2d   :  { %s364_s20 = sld [smem:[#allocation2 + $0x302]]  ;;  %s366_s0 = sld [smem:[#allocation2 + $0x303]]  ;;  %v95_v17 = vstv %s332_s8  ;;  %v107_v20 = vstv %s334_s9  ;;  %v93_v23 = vmul.f32 %v92_v13, %v39_v4  ;;  %v78_v52 = vmul.f32 %v77_v16, %v39_v4 }
  0x2e   :  { %s375_s21 = sld [smem:[#allocation2 + $0x102]]  ;;  %v110_v21 = vstv %s336_s10  ;;  %v114_v22 = vstv %s338_s11  ;;  %v108_v24 = vmul.f32 %v107_v20, %v39_v4  ;;  %v96_v27 = vmul.f32 %v95_v17, %v41_v6  ;;  %s384_s22 = sld [smem:[#allocation2 + $0x3]] }
  0x2f   :  { %v111_v25 = vmul.f32 %v110_v21, %v41_v6  ;;  %v115_v26 = vmul.f32 %v114_v22, %v361_v9  ;;  %v118_v28 = vstv %s340_s12  ;;  %v123_v29 = vstv %s342_s13  ;;  %s386_s23 = sld [smem:[#allocation2 + $0x183]]  ;;  %s283_s25 = smov [#allocation7]  }
  0x30   :  { %v126_v30 = vstv %s344_s14  ;;  %v119_v32 = vmul.f32 %v118_v28, %v372_v18  ;;  %v124_v33 = vmul.f32 %v123_v29, %v39_v4  ;;  %v99_v35 = vstv %s349_s15  ;;  %s393_s24 = sld [smem:[#allocation2 + $0x103]]  ;;  %s169_s26 = sshll.u32 %s283_s25, 4  ;;  %s170_s26 = int_to_ptr.vmem [resolvable:$true] %s169_s26 }
  0x31   :  { %v112_v31 = vadd.f32 %v111_v25, %v108_v24  ;;  %v127_v34 = vmul.f32 %v126_v30, %v41_v6  ;;  %v130_v36 = vstv %s351_s16  ;;  %v134_v37 = vstv %s354_s17  ;;  %s251_s27 = scalar_lea.vmem %s170_s26, 128  ;;  %p256_p0 = scmp.lt.s32.totalorder %s170_s26, %s170_s26 }
  0x32   :  { %v139_v38 = vstv %s356_s18  ;;  %v131_v41 = vmul.f32 %v130_v36, %v361_v9  ;;  %v135_v42 = vmul.f32 %v134_v37, %v372_v18  ;;  %v142_v44 = vstv %s359_s19  ;;  %p252_p13 = scmp.ne.s32.totalorder %s170_s26, %s251_s27  ;;  %p257_p1 = scmp.lt.s32.totalorder %s251_s27, %s251_s27 }
  0x33   :  { %v116_v39 = vadd.f32 %v115_v26, %v112_v31  ;;  %v128_v40 = vadd.f32 %v127_v34, %v124_v33  ;;  %v140_v43 = vmul.f32 %v139_v38, %v39_v4  ;;  %v146_v45 = vstv %s364_s20 }
  0x34   :  { %v150_v46 = vstv %s366_s0  ;;  %v143_v49 = vmul.f32 %v142_v44, %v41_v6  ;;  %v147_v50 = vmul.f32 %v146_v45, %v361_v9  ;;  %v81_v53 = vmul.f32 %v80_v19, %v41_v6  ;;  %p258_p2 = por %p257_p1, %p256_p0 }
  0x35   :  { %v120_v47 = vadd.f32 %v119_v32, %v116_v39  ;;  %v132_v48 = vadd.f32 %v131_v41, %v128_v40  ;;  %v84_v54 = vstv %s375_s21  ;;  %v151_v57 = vmul.f32 %v150_v46, %v372_v18 }
  0x36   :  { %v144_v56 = vadd.f32 %v143_v49, %v140_v43  ;;  %v97_v60 = vadd.f32 %v96_v27, %v93_v23  ;;  %v100_v61 = vmul.f32 %v99_v35, %v361_v9  ;;  %v58_v62 = vstv %s384_s22  ;;  %p259_p3 = pnand %p258_p2, %p252_p13 }
  0x37   :  { %211 = vtanh.f32 %v120_v47  ;;  %v136_v55 = vadd.f32 %v135_v42, %v132_v48  ;;  %v103_v63 = vstv %s386_s23  ;;  %v71_v1 = vadd.f32 %v70_v14, %v67_v51 }
  0x38   :  { %v148_v0 = vadd.f32 %v147_v50, %v144_v56  ;;  %v74_v2 = vmul.f32 %v73_v15, %v372_v18  ;;  %v82_v3 = vadd.f32 %v81_v53, %v78_v52  ;;  %v85_v4 = vmul.f32 %v84_v54, %v361_v9 }
  0x39   :  { %213 = vtanh.f32 %v136_v55  ;;  %v88_v5 = vstv %s393_s24  ;;  %v56_v11 = vadd.f32 %v55_v59, %v52_v58  ;;  %v59_v7 = vmul.f32 %v58_v62, %v372_v18 }
  0x3a   :  { %v152_v6 = vadd.f32 %v151_v57, %v148_v0  ;;  %v101_v10 = vadd.f32 %v100_v61, %v97_v60  ;;  %v104_v8 = vmul.f32 %v103_v63, %v372_v18  ;;  %v75_v12 = vadd.f32 %v74_v2, %v71_v1 }
  0x3b   :  { %v86_v13 = vadd.f32 %v85_v4, %v82_v3  ;;  %v89_v16 = vmul.f32 %v88_v5, %v372_v18  ;;  %v60_v17 = vadd.f32 %v59_v7, %v56_v11 }
  0x3c   :  { %215 = vtanh.f32 %v152_v6  ;;  %v105_v14 = vadd.f32 %v104_v8, %v101_v10 }
  0x3d   :  { %v90_v15 = vadd.f32 %v89_v16, %v86_v13 }
  0x41   :  { %v212_v19 = vpop.eup %211 }
  0x42   :  { %v154_v20 = vmul.f32 %v212_v19, %v75_v12 }
  0x43   :  { %v214_v21 = vpop.eup %213 }
  0x44   :  { %v155_v9 = vadd.f32 %v154_v20, %v60_v17  ;;  %v156_v22 = vmul.f32 %v214_v21, %v105_v14 }
  0x46   :  { %v157_v23 = vadd.f32 %v156_v22, %v90_v15  ;;  %v216_v24 = vpop.eup %215 }
  0x48   :  { %v158_v25 = vadd.f32 %v157_v23, %v155_v9  ;;  %v159_v26 = vsub.f32 %v155_v9, %v157_v23 }
  0x4a   :  { %v160_v27 = vmul.f32 %v216_v24, %v159_v26 }
  0x4c   :  { %v161_v28 = vadd.f32 %v160_v27, %v158_v25 }
  0x4e   :  { %162 = vst [vmem:[#allocation7] sm:$0xff] %v161_v28 }
  0x4f   :  { %262 = shalt.err (!%p259_p3)
}
  0x50   :  { %s263_s30 = scalar_lea.hbm %s427_s2, 128 }
  0x51   :  { %p264_p4 = scmp.ne.s32.totalorder %s427_s2, %s263_s30  ;;  %p267_p5 = scmp.lt.u32.totalorder %s263_s30, %s427_s2 }
  0x53   :  { %p269_p6 = pnand %p267_p5, %p264_p4 }
  0x55   :  { %272 = shalt.err (!%p269_p6)
}
  0x56   :  { %172 = dma.vmem_to_hbm [thread:$0]  %s170_s26, 128, %s427_s2, [#allocation4]  }
  0x57   :  { %277 = dma.done.wait [#allocation4], 128  }
  0x58   :  { %278 = vsyncadd [#allocation4], 4294967168 }
  0x59   :  { %176 = vsyncpa [#allocation3], 1 }
  0x5a   :  { %177 = vsyncpa [#allocation4], 1 }
  0x5b   :  { %178 = vsyncpa [#allocation5], 1 }

</bundles_post_ra>
